<compile_context>
chip_gen: v5e
topology: v5e:2x2
jax: 0.10.0
libtpu: 0.0.40
codegen_flags: <defaults>
</compile_context>

<pallas_src>
import functools
import math

import jax
import jax.numpy as jnp
from jax import lax
from jax.experimental import pallas as pl
from jax.experimental.pallas import tpu as pltpu


_VMEM_LIMIT = 48 * 1024 * 1024  # fits v7x's 64 MiB physical VMEM; ample on v5e/v6e


# ------------------------------ tile pickers ------------------------------

def _tile_lane(dim, target):
    """Lane (minor) tile: prefer multiples of 256 (v6e/v7x MXU), then 128."""
    if dim <= target:
        return dim
    for step in (256, 128):
        t = (target // step) * step
        while t >= step:
            if dim % t == 0:
                return t
            t -= step
    return dim


def _tile_sublane(dim, target):
    """Sublane (second-minor) tile: multiple of 8, else full dim."""
    if dim <= target:
        return dim
    t = (target // 8) * 8
    while t >= 8:
        if dim % t == 0:
            return t
        t -= 8
    return dim


# ------------------------------ Pallas kernels ------------------------------

def _norm_linear_kernel(x_ref, g_ref, w_ref, *rest, has_bias, activation, eps):
    """Fused RMSNorm prologue (cached per M-row block) + matmul (+bias, +GELU)."""
    if has_bias:
        b_ref, o_ref, xn_ref = rest
    else:
        o_ref, xn_ref = rest
        b_ref = None

    # Normalize once per M-row block; reuse across all N tiles (j axis).
    @pl.when(pl.program_id(1) == 0)
    def _():
        x = x_ref[...].astype(jnp.float32)                    # (tm, K)
        ms = jnp.mean(x * x, axis=-1, keepdims=True)          # f32 stats
        xn = x * lax.rsqrt(ms + eps) * g_ref[...].astype(jnp.float32)
        xn_ref[...] = xn.astype(xn_ref.dtype)                 # bf16 scratch

    y = jnp.dot(xn_ref[...], w_ref[...],
                preferred_element_type=jnp.float32)           # bf16 MXU, f32 acc
    if b_ref is not None:
        y = y + b_ref[...].astype(jnp.float32)
    if activation == "gelu":
        c = math.sqrt(2.0 / math.pi)
        y = 0.5 * y * (1.0 + jnp.tanh(c * (y + 0.044715 * y * y * y)))
    o_ref[...] = y.astype(o_ref.dtype)


def _linear_acc_kernel(x_ref, w_ref, *rest, has_bias, has_residual, activation):
    """K-tiled matmul with f32 accumulator; bias / GELU / residual epilogue."""
    idx = 0
    b_ref = None
    res_ref = None
    if has_bias:
        b_ref = rest[idx]
        idx += 1
    if has_residual:
        res_ref = rest[idx]
        idx += 1
    o_ref = rest[idx]
    acc_ref = rest[idx + 1]

    @pl.when(pl.program_id(2) == 0)
    def _():
        acc_ref[...] = jnp.zeros_like(acc_ref)

    acc_ref[...] += jnp.dot(x_ref[...], w_ref[...],
                            preferred_element_type=jnp.float32)

    @pl.when(pl.program_id(2) == pl.num_programs(2) - 1)
    def _():
        y = acc_ref[...]
        if b_ref is not None:
            y = y + b_ref[...].astype(jnp.float32)
        if activation == "gelu":
            c = math.sqrt(2.0 / math.pi)
            y = 0.5 * y * (1.0 + jnp.tanh(c * (y + 0.044715 * y * y * y)))
        if res_ref is not None:
            y = y + res_ref[...].astype(jnp.float32)
        o_ref[...] = y.astype(o_ref.dtype)


def _attn_kernel(qkv_ref, o_ref, acc_ref, *, num_heads, head_dim, model_dim,
                 q_tile, seq_len):
    """Causal MHA: one (batch, q-tile) per grid step, all heads, bf16 MXU path.

    qkv_ref: (1, S, 3D) packed [Q|K|V] for the current batch (resident across
    q tiles).  o_ref: (1, tq, D).  acc_ref: (tq, D) f32 scratch head sink.
    """
    # TODO(synk): for very long S, add a KV grid axis with online softmax and
    # causal block skipping; (tq, S) score tiles are fine at these lengths.
    qi = pl.program_id(1)
    q_start = pl.multiple_of(qi * q_tile, q_tile)
    scale = 1.0 / math.sqrt(head_dim)

    row = q_start + lax.broadcasted_iota(jnp.int32, (q_tile, seq_len), 0)
    col = lax.broadcasted_iota(jnp.int32, (q_tile, seq_len), 1)
    mask = col > row
    neg = jnp.float32(-1e30)  # finite negative (avoids NaN if a row were masked)

    for h in range(num_heads):
        lo = h * head_dim
        # bf16 loads straight from the packed block; scale folded into q.
        q = qkv_ref[0, pl.ds(q_start, q_tile), pl.ds(lo, head_dim)]
        q = (q.astype(jnp.float32) * scale).astype(q.dtype)           # (tq, dh)
        k = qkv_ref[0, :, pl.ds(model_dim + lo, head_dim)]            # (S, dh)
        v = qkv_ref[0, :, pl.ds(2 * model_dim + lo, head_dim)]        # (S, dh)

        # qd,kd->qk: contract last dims, no explicit transpose of K.
        s = lax.dot_general(q, k, (((1,), (1,)), ((), ())),
                            preferred_element_type=jnp.float32)       # (tq, S)
        s = jnp.where(mask, neg, s)
        m = jnp.max(s, axis=-1, keepdims=True)
        e = jnp.exp(s - m)
        denom = jnp.sum(e, axis=-1, keepdims=True)
        # Deferred normalization: e @ v first, then one reciprocal per row (EUP).
        o_h = jnp.dot(e.astype(v.dtype), v,
                      preferred_element_type=jnp.float32)             # (tq, dh)
        acc_ref[:, lo:lo + head_dim] = o_h * pl.reciprocal(denom, approx=True)

    # single lane-dense store of the merged heads
    o_ref[0] = acc_ref[...].astype(o_ref.dtype)


# ------------------------------ kernel wrappers ------------------------------

def norm_linear(x2d, g_row, w, b=None, activation="none", out_dtype=None,
                tm_target=512, tn_target=512):
    """y = rmsnorm(x) * g @ w (+ b) (+ gelu), gridded over (M, N)."""
    m, k = x2d.shape
    n = w.shape[1]
    out_dtype = out_dtype or x2d.dtype

    # Pad large, non-128-divisible N (e.g. GPT-2 vocab 50257) so the lane tile
    # never degenerates to the full dimension / blows VMEM.
    n_pad = 0
    if n > 128 and n % 128 != 0:
        n_pad = (-n) % 128
        w = jnp.pad(w, ((0, 0), (0, n_pad)))
        if b is not None:
            b = jnp.pad(b, ((0, 0), (0, n_pad)))
    n_full = n + n_pad

    tm = _tile_sublane(m, tm_target)
    tn = _tile_lane(n_full, tn_target)

    in_specs = [
        pl.BlockSpec((tm, k), lambda i, j: (i, 0)),
        pl.BlockSpec((1, k), lambda i, j: (0, 0)),
        pl.BlockSpec((k, tn), lambda i, j: (0, j)),
    ]
    args = [x2d, g_row, w]
    if b is not None:
        in_specs.append(pl.BlockSpec((1, tn), lambda i, j: (0, j)))
        args.append(b)

    kern = functools.partial(_norm_linear_kernel, has_bias=b is not None,
                             activation=activation, eps=1e-5)
    out = pl.pallas_call(
        kern,
        out_shape=jax.ShapeDtypeStruct((m, n_full), out_dtype),
        grid=(m // tm, n_full // tn),
        in_specs=in_specs,
        out_specs=pl.BlockSpec((tm, tn), lambda i, j: (i, j)),
        scratch_shapes=[pltpu.VMEM((tm, k), w.dtype)],   # cached normalized x
        compiler_params=pltpu.CompilerParams(
            dimension_semantics=("parallel", "arbitrary"),
            vmem_limit_bytes=_VMEM_LIMIT),
    )(*args)
    if n_pad:
        out = out[:, :n]
    return out


def linear_acc(x2d, w, b=None, residual=None, activation="none",
               out_dtype=None, tm_target=512, tn_target=512, tk_target=512):
    """y = x @ w (+ b) (+ gelu) (+ residual), K-tiled with f32 accumulator."""
    m, k = x2d.shape
    n = w.shape[1]
    out_dtype = out_dtype or x2d.dtype
    tm = _tile_sublane(m, tm_target)
    tn = _tile_lane(n, tn_target)
    tk = _tile_lane(k, tk_target)

    in_specs = [
        pl.BlockSpec((tm, tk), lambda i, j, kk: (i, kk)),
        pl.BlockSpec((tk, tn), lambda i, j, kk: (kk, j)),
    ]
    args = [x2d, w]
    if b is not None:
        in_specs.append(pl.BlockSpec((1, tn), lambda i, j, kk: (0, j)))
        args.append(b)
    if residual is not None:
        in_specs.append(pl.BlockSpec((tm, tn), lambda i, j, kk: (i, j)))
        args.append(residual)

    kern = functools.partial(_linear_acc_kernel, has_bias=b is not None,
                             has_residual=residual is not None,
                             activation=activation)
    return pl.pallas_call(
        kern,
        out_shape=jax.ShapeDtypeStruct((m, n), out_dtype),
        grid=(m // tm, n // tn, k // tk),
        in_specs=in_specs,
        out_specs=pl.BlockSpec((tm, tn), lambda i, j, kk: (i, j)),
        scratch_shapes=[pltpu.VMEM((tm, tn), jnp.float32)],
        compiler_params=pltpu.CompilerParams(
            dimension_semantics=("parallel", "parallel", "arbitrary"),
            vmem_limit_bytes=_VMEM_LIMIT),
    )(*args)


def causal_attention(qkv, num_heads, out_dtype, tq_target=256):
    """qkv: (B, S, 3D) packed [Q|K|V] -> (B, S, D) context.

    Grid is (batch, query-tile); the packed (S, 3D) block stays resident across
    query tiles (block index constant along that axis).
    """
    b, s, threed = qkv.shape
    d = threed // 3
    dh = d // num_heads
    tq = _tile_sublane(s, tq_target)

    kern = functools.partial(_attn_kernel, num_heads=num_heads, head_dim=dh,
                             model_dim=d, q_tile=tq, seq_len=s)
    return pl.pallas_call(
        kern,
        out_shape=jax.ShapeDtypeStruct((b, s, d), out_dtype),
        grid=(b, s // tq),
        in_specs=[pl.BlockSpec((1, s, threed), lambda bi, qi: (bi, 0, 0))],
        out_specs=pl.BlockSpec((1, tq, d), lambda bi, qi: (bi, qi, 0)),
        scratch_shapes=[pltpu.VMEM((tq, d), jnp.float32)],   # head-output sink
        compiler_params=pltpu.CompilerParams(
            dimension_semantics=("parallel", "parallel"),
            vmem_limit_bytes=_VMEM_LIMIT),
    )(qkv)


# ------------------------------ model definition ------------------------------

def init_params(key, cfg, dtype=jnp.bfloat16):
    d = cfg["embedding_dim"]
    v = cfg["vocab_size"]
    c = cfg["context_length"]
    n_layers = cfg["num_layers"]
    qkv_bias = cfg.get("qkv_bias", False)

    def nrm(k, shape):
        return (0.02 * jax.random.normal(k, shape, jnp.float32)).astype(dtype)

    keys = jax.random.split(key, 3 + n_layers)
    params = {
        "tok_emb": nrm(keys[0], (v, d)),
        "pos_emb": nrm(keys[1], (c, d)),
        "final_norm_w": jnp.ones((1, d), dtype),
        "out_head_w": nrm(keys[2], (d, v)),          # bias=False
        "blocks": [],
    }
    for layer in range(n_layers):
        ks = jax.random.split(keys[3 + layer], 6)
        blk = {
            "norm1_w": jnp.ones((1, d), dtype),
            "norm2_w": jnp.ones((1, d), dtype),
            # fused QKV weight: output columns [0:D]=Q, [D:2D]=K, [2D:3D]=V
            "w_qkv": jnp.concatenate(
                [nrm(ks[0], (d, d)), nrm(ks[1], (d, d)), nrm(ks[2], (d, d))],
                axis=1),
            # skip the zero bias entirely when qkv_bias=False (less DMA/VALU)
            "b_qkv": jnp.zeros((1, 3 * d), dtype) if qkv_bias else None,
            "wo": nrm(ks[3], (d, d)), "bo": jnp.zeros((1, d), dtype),
            "w_ff1": nrm(ks[4], (d, 4 * d)), "b_ff1": jnp.zeros((1, 4 * d), dtype),
            "w_ff2": nrm(ks[5], (4 * d, d)), "b_ff2": jnp.zeros((1, d), dtype),
        }
        params["blocks"].append(blk)
    return params


def transformer_block(x2d, blk, num_heads, b, s):
    d = x2d.shape[1]
    # pre-RMSNorm + fused QKV projection (single MXU pass, N = 3D)
    qkv = norm_linear(x2d, blk["norm1_w"], blk["w_qkv"], blk["b_qkv"])
    # causal multi-head attention on the packed QKV (no transpose glue)
    ctx = causal_attention(qkv.reshape(b, s, 3 * d), num_heads, x2d.dtype)
    # output projection with the residual add fused in the epilogue
    x2d = linear_acc(ctx.reshape(b * s, d), blk["wo"], blk["bo"], residual=x2d)
    # pre-RMSNorm + FF1 + tanh-GELU fused
    h = norm_linear(x2d, blk["norm2_w"], blk["w_ff1"], blk["b_ff1"],
                    activation="gelu")
    # FF2 with the residual add fused in the epilogue
    x2d = linear_acc(h, blk["w_ff2"], blk["b_ff2"], residual=x2d)
    return x2d


def modified_gpt2_forward(params, in_idx, cfg):
    b, s = in_idx.shape
    d = cfg["embedding_dim"]
    # Embedding lookups are data-dependent gathers -> plain JAX glue.
    tok = jnp.take(params["tok_emb"], in_idx, axis=0)          # (B, S, D)
    pos = params["pos_emb"][:s]                                # (S, D)
    # TODO(synk): pos-add could be folded into the first block's norm prologue,
    # but the summed activation is still needed as the residual stream.
    x = (tok + pos[None, :, :]).astype(jnp.bfloat16)
    # self.dropout: identity at inference (eval mode)
    x2d = x.reshape(b * s, d)
    for blk in params["blocks"]:
        x2d = transformer_block(x2d, blk, cfg["num_heads"], b, s)
    # final RMSNorm fused into the (bias-free) lm-head projection
    logits = norm_linear(x2d, params["final_norm_w"], params["out_head_w"],
                         b=None, out_dtype=jnp.float32)
    return logits.reshape(b, s, cfg["vocab_size"])


# ----------------------------------- main -----------------------------------

if __name__ == "__main__":
    cfg = dict(
        vocab_size=128,
        context_length=16,
        embedding_dim=32,
        num_heads=4,
        num_layers=2,
        drop_rate=0.1,     # dropout is identity at inference
        qkv_bias=False,    # no QKV bias -> not allocated, not DMA'd
    )
    key = jax.random.PRNGKey(0)
    pkey, dkey = jax.random.split(key)
    params = init_params(pkey, cfg)

    batch, seq = 2, 8
    in_idx = jax.random.randint(dkey, (batch, seq), 0, cfg["vocab_size"],
                                dtype=jnp.int32)

    logits = modified_gpt2_forward(params, in_idx, cfg)
    jax.block_until_ready(logits)
    assert logits.shape == (batch, seq, cfg["vocab_size"])
    assert logits.dtype == jnp.float32
    # TODO(synk): training-mode dropout is not implemented in-kernel; forward
    # matches eval() semantics of the PyTorch module.  GELU uses the tanh
    # approximation (standard in GPT-2-from-scratch implementations).
    print("KERNEL_OK")
</pallas_src>

<mosaic_0001>
module attributes {stable_mosaic.version = 11 : i64} {
  func.func @_norm_linear_kernel(%arg0: i32, %arg1: i32, %arg2: memref<16x32xbf16, #tpu.memory_space<vmem>>, %arg3: memref<1x32xbf16, #tpu.memory_space<vmem>>, %arg4: memref<32x96xbf16, #tpu.memory_space<vmem>>, %arg5: memref<16x96xbf16, #tpu.memory_space<vmem>>, %arg6: memref<16x32xbf16, #tpu.memory_space<vmem>>) attributes {dimension_semantics = [#tpu.dimension_semantics<parallel>, #tpu.dimension_semantics<arbitrary>], iteration_bounds = array<i64: 1, 1>, scalar_prefetch = 0 : i64, scratch_operands = 1 : i64, tpu.core_type = #tpu.core_type<tc>, window_params = [{transform_indices = @transform_0, window_bounds = array<i64: 16, 32>}, {pipeline_mode = #tpu.pipeline_mode<synchronous>, transform_indices = @transform_1, window_bounds = array<i64: 1, 32>}, {transform_indices = @transform_2, window_bounds = array<i64: 32, 96>}, {transform_indices = @transform_3, window_bounds = array<i64: 16, 96>}]} {
    %c0_i32 = arith.constant 0 : i32
    %0 = arith.cmpi eq, %arg1, %c0_i32 : i32
    %1 = arith.extui %0 : i1 to i32
    %c0_i32_0 = arith.constant 0 : i32
    %2 = arith.cmpi ne, %1, %c0_i32_0 : i32
    scf.if %2 {
      %c0_6 = arith.constant 0 : index
      %c0_7 = arith.constant 0 : index
      %8 = vector.load %arg2[%c0_6, %c0_7] : memref<16x32xbf16, #tpu.memory_space<vmem>>, vector<16x32xbf16>
      %9 = arith.extf %8 : vector<16x32xbf16> to vector<16x32xf32>
      %10 = arith.mulf %9, %9 : vector<16x32xf32>
      %cst_8 = arith.constant dense<0.000000e+00> : vector<16xf32>
      %11 = vector.multi_reduction <add>, %10, %cst_8 [1] : vector<16x32xf32> to vector<16xf32>
      %12 = vector.shape_cast %11 : vector<16xf32> to vector<16x1xf32>
      %cst_9 = arith.constant 3.200000e+01 : f32
      %13 = vector.broadcast %cst_9 : f32 to vector<16x1xf32>
      %14 = arith.divf %12, %13 : vector<16x1xf32>
      %cst_10 = arith.constant 9.99999974E-6 : f32
      %15 = vector.broadcast %cst_10 : f32 to vector<16x1xf32>
      %16 = arith.addf %14, %15 : vector<16x1xf32>
      %17 = math.rsqrt %16 : vector<16x1xf32>
      %18 = vector.broadcast %17 : vector<16x1xf32> to vector<16x32xf32>
      %19 = arith.mulf %9, %18 : vector<16x32xf32>
      %c0_11 = arith.constant 0 : index
      %c0_12 = arith.constant 0 : index
      %20 = vector.load %arg3[%c0_11, %c0_12] : memref<1x32xbf16, #tpu.memory_space<vmem>>, vector<1x32xbf16>
      %21 = arith.extf %20 : vector<1x32xbf16> to vector<1x32xf32>
      %22 = vector.broadcast %21 : vector<1x32xf32> to vector<16x32xf32>
      %23 = arith.mulf %19, %22 : vector<16x32xf32>
      %24 = arith.truncf %23 : vector<16x32xf32> to vector<16x32xbf16>
      %c0_13 = arith.constant 0 : index
      %c0_14 = arith.constant 0 : index
      %25 = vector.load %arg6[%c0_13, %c0_14] : memref<16x32xbf16, #tpu.memory_space<vmem>>, vector<16x32xbf16>
      tpu.vector_store %arg6[%c0_13, %c0_14], %24 {strides = array<i32>} : memref<16x32xbf16, #tpu.memory_space<vmem>>, vector<16x32xbf16>,
    } else {
    }
    %c0 = arith.constant 0 : index
    %c0_1 = arith.constant 0 : index
    %3 = vector.load %arg6[%c0, %c0_1] : memref<16x32xbf16, #tpu.memory_space<vmem>>, vector<16x32xbf16>
    %c0_2 = arith.constant 0 : index
    %c0_3 = arith.constant 0 : index
    %4 = vector.load %arg4[%c0_2, %c0_3] : memref<32x96xbf16, #tpu.memory_space<vmem>>, vector<32x96xbf16>
    %cst = arith.constant dense<0.000000e+00> : vector<16x96xf32>
    %5 = tpu.matmul %3, %4, %cst {dimension_numbers = #tpu.dot_dimension_numbers<[1], [0], [0], [1], [0, 0, 1, 1], [], []>} : vector<16x32xbf16>, vector<32x96xbf16>, vector<16x96xf32> -> vector<16x96xf32>
    %6 = arith.truncf %5 : vector<16x96xf32> to vector<16x96xbf16>
    %c0_4 = arith.constant 0 : index
    %c0_5 = arith.constant 0 : index
    %7 = vector.load %arg5[%c0_4, %c0_5] : memref<16x96xbf16, #tpu.memory_space<vmem>>, vector<16x96xbf16>
    tpu.vector_store %arg5[%c0_4, %c0_5], %6 {strides = array<i32>} : memref<16x96xbf16, #tpu.memory_space<vmem>>, vector<16x96xbf16>,
    return
  }
  func.func @transform_0(%arg0: i32, %arg1: i32) -> (i32, i32) {
    %c0_i32 = arith.constant 0 : i32
    %c0_i32_0 = arith.constant 0 : i32
    return %arg0, %c0_i32 : i32, i32
  }
  func.func @transform_1(%arg0: i32, %arg1: i32) -> (i32, i32) {
    %c0_i32 = arith.constant 0 : i32
    %c0_i32_0 = arith.constant 0 : i32
    %c0_i32_1 = arith.constant 0 : i32
    return %c0_i32, %c0_i32_0 : i32, i32
  }
  func.func @transform_2(%arg0: i32, %arg1: i32) -> (i32, i32) {
    %c0_i32 = arith.constant 0 : i32
    %c0_i32_0 = arith.constant 0 : i32
    return %c0_i32, %arg1 : i32, i32
  }
  func.func @transform_3(%arg0: i32, %arg1: i32) -> (i32, i32) {
    %c0_i32 = arith.constant 0 : i32
    return %arg0, %arg1 : i32, i32
  }
}

</mosaic_0001>

<bundles_post_ra>
// kernel: tpu_custom_call.1
= control target key start
LH: loop header
LB: loop body
LE: loop exit
PB: predicated region body
PF: predicated region fallthrough
CT: control target
= control target key end

     0   :  { %8 = vsyncpa [#allocation4], 0  ;;  %s373_s0 = inlined_call_operand.hbm [shape: bf16[16,32], index: 0, kind: input, shape index: {}]   ;;  %s374_s1 = inlined_call_operand.hbm [shape: bf16[1,32], index: 1, kind: input, shape index: {}]   ;;  %s375_s2 = inlined_call_operand.hbm [shape: bf16[32,96], index: 2, kind: input, shape index: {}]   ;;  %s376_s3 = inlined_call_operand.hbm [shape: bf16[16,96], index: 3, kind: output, shape index: {}]  }
   0x1   :  { %9 = vsyncpa [#allocation7], 0  ;;  %s29_s14 = sshll.u32 %s374_s1, 4  ;;  %s30_s14 = int_to_ptr.hbm [resolvable:$true] %s29_s14 }
   0x2   :  { %10 = vsyncpa [#allocation5], 0  ;;  %s322_s15 = smov [#allocation6]   ;;  %s15_s19 = sshll.u32 %s373_s0, 4  ;;  %s16_s19 = int_to_ptr.hbm [resolvable:$true] %s15_s19 }
   0x3   :  { %s31_s16 = sshll.u32 %s322_s15, 4  ;;  %s323_s20 = smov [#allocation3]   ;;  %s32_s16 = int_to_ptr.vmem [resolvable:$true] %s31_s16 }
   0x4   :  { %34 = dma.hbm_to_vmem [thread:$0]  %s30_s14, 16, %s32_s16, [#allocation7]  }
   0x5   :  { %s17_s21 = sshll.u32 %s323_s20, 4  ;;  %s324_s22 = smov 64   ;;  %s18_s21 = int_to_ptr.vmem [resolvable:$true] %s17_s21 }
   0x6   :  { %s325_s23 = smov 4   ;;  %s39_s25 = sshll.u32 %s375_s2, 4  ;;  %s40_s25 = int_to_ptr.hbm [resolvable:$true] %s39_s25 }
   0x7   :  { %23 = dma.hbm_to_vmem [thread:$0]  %s16_s19, 128, %s18_s21, [#allocation4], %s324_s22, %s324_s22, %s325_s23  }
   0x8   :  { %s326_s26 = smov [#allocation8]  }
   0x9   :  { %s41_s27 = sshll.u32 %s326_s26, 4  ;;  %s42_s27 = int_to_ptr.vmem [resolvable:$true] %s41_s27 }
   0xa   :  { %47 = dma.hbm_to_vmem [thread:$0]  %s40_s25, 256, %s42_s27, [#allocation7], %s324_s22, %s324_s22, %s325_s23  }
   0xb   :  { %316 = dma.done.wait [#allocation4], 128  }
   0xc   :  { %317 = vsyncadd [#allocation4], 4294967168 }
   0xd   :  { %318 = dma.done.wait [#allocation7], 272  }
   0xe   :  { %319 = vsyncadd [#allocation7], 4294967024  ;;  %v204_v0 = vld [vmem:[#allocation3] sm:$0xff]   ;;  %vm71_vm0 = vcmask 261120   ;;  %v327_v7 = vmov 32.0   ;;  %v202_v17 = vld [vmem:[#allocation8 + $0x8] sm:$0xff] }
   0xf   :  { %v205_v1 = vunpack.c.l.bf16 %v204_v0  ;;  %v206_v3 = vunpack.c.h.bf16 %v204_v0  ;;  %214 = vrcp.f32 %v327_v7  ;;  %154 = vmatpush.bf16.msra.mxu0 %v202_v17  ;;  %v201_v18 = vld [vmem:[#allocation8] sm:$0xff]  ;;  %v111_v24 = vld [vmem:[#allocation6] sm:$0x1]  ;;  %vm118_vm5 = vcmask 257024   ;;  %s328_s0 = smov [#allocation9]   ;;  %s173_s30 = sshll.u32 %s376_s3, 4  ;;  %s174_s30 = int_to_ptr.hbm [resolvable:$true] %s173_s30 }
  0x10   :  { %v112_v27 = vunpack.c.l.bf16 %v111_v24  ;;  %vm164_vm9 = vcmask 781312   ;;  %s171_s2 = sshll.u32 %s328_s0, 4  ;;  %s172_s2 = int_to_ptr.vmem [resolvable:$true] %s171_s2 }
  0x11   :  { %v69_v2 = vmul.f32 %v205_v1, %v205_v1  ;;  %v70_v5 = vmul.f32 %v206_v3, %v206_v3 }
  0x12   :  { %v113_v32 = vperm.slane %v112_v27, 0 }
  0x13   :  { %v72_v4 = vsel %vm71_vm0, %v69_v2, 0.0  ;;  %v75_v6 = vsel %vm71_vm0, %v70_v5, 0.0  ;;  %155 = vmatpush.bf16.msra.mxu0 %v201_v18 }
  0x14   :  { %73 = vadd.xlane.f32.xlu0 %v72_v4 }
  0x15   :  { %v215_v8 = vpop.eup %214 }
  0x16   :  { %v79_v9 = vmul.f32 32.0, %v215_v8  ;;  %vm83_vm1 = vweird.f32 %v215_v8 }
  0x18   :  { %v80_v10 = vsub.f32 1.0, %v79_v9 }
  0x1a   :  { %v81_v11 = vmul.f32 %v215_v8, %v80_v10 }
  0x1c   :  { %76 = vadd.xlane.f32.xlu0 %v75_v6  ;;  %v82_v12 = vadd.f32 %v215_v8, %v81_v11 }
  0x1e   :  { %v84_v13 = vsel %vm83_vm1, %v215_v8, %v82_v12 }
  0x87   :  { %v74_v14 = vpop.xlane.xlu0 %73 }
  0x88   :  { %v85_v15 = vmul.f32 %v84_v13, %v74_v14 }
  0x8a   :  { %v87_v16 = vadd.f32 1e-05, %v85_v15 }
  0x8c   :  { %216 = vrsqrt.f32 %v87_v16  ;;  %vm95_vm3 = vweird.f32 %v87_v16 }
  0x8f   :  { %v77_v19 = vpop.xlane.xlu0 %76 }
  0x90   :  { %v86_v20 = vmul.f32 %v84_v13, %v77_v19 }
  0x92   :  { %v217_v21 = vpop.eup %216  ;;  %v88_v22 = vadd.f32 1e-05, %v86_v20 }
  0x93   :  { %v90_v23 = vmul.f32 %v217_v21, %v87_v16  ;;  %vm96_vm2 = vweird.f32 %v217_v21 }
  0x94   :  { %218 = vrsqrt.f32 %v88_v22  ;;  %vm97_vm4 = vmor %vm95_vm3, %vm96_vm2  ;;  %vm105_vm7 = vweird.f32 %v88_v22 }
  0x95   :  { %v91_v25 = vmul.f32 %v217_v21, %v90_v23 }
  0x97   :  { %v92_v26 = vmul.f32 0.5, %v91_v25 }
  0x99   :  { %v93_v28 = vsub.f32 1.5, %v92_v26 }
  0x9a   :  { %v219_v29 = vpop.eup %218 }
  0x9b   :  { %v94_v30 = vmul.f32 %v217_v21, %v93_v28  ;;  %v100_v31 = vmul.f32 %v219_v29, %v88_v22  ;;  %vm106_vm6 = vweird.f32 %v219_v29 }
  0x9c   :  { %vm107_vm8 = vmor %vm105_vm7, %vm106_vm6 }
  0x9d   :  { %v98_v33 = vsel %vm97_vm4, %v217_v21, %v94_v30  ;;  %v101_v34 = vmul.f32 %v219_v29, %v100_v31 }
  0x9e   :  { %v109_v35 = vmul.f32 %v205_v1, %v98_v33 }
  0x9f   :  { %v102_v36 = vmul.f32 0.5, %v101_v34 }
  0xa0   :  { %v114_v37 = vmul.f32 %v113_v32, %v109_v35 }
  0xa1   :  { %v103_v38 = vsub.f32 1.5, %v102_v36 }
  0xa2   :  { %v116_v39 = vpack.c.bf16 %v114_v37, %v114_v37 }
  0xa3   :  { %v104_v40 = vmul.f32 %v219_v29, %v103_v38 }
  0xa4   :  { %119 = vst.msk [vmem:[#allocation2] sm:$0xf] %vm118_vm5, %v116_v39 }
  0xa5   :  { %v108_v41 = vsel %vm107_vm8, %v219_v29, %v104_v40 }
  0xa6   :  { %v110_v42 = vmul.f32 %v206_v3, %v108_v41 }
  0xa8   :  { %v115_v43 = vmul.f32 %v113_v32, %v110_v42 }
  0xaa   :  { %v117_v44 = vpack.c.bf16 %v115_v43, %v115_v43 }
  0xac   :  { %120 = vst.msk [vmem:[#allocation2 + $0x4] sm:$0xf] %vm118_vm5, %v117_v44 }
  0xb3   :  { %v200_v45 = vld [vmem:[#allocation2] sm:$0xff] }
  0xb4   :  { %199 = vmatmul.msk.bf16.vlgmr.msra.gmra.mxu0 %vm71_vm0, %v200_v45 }
 0x131   :  { %v157_v46 = vpop.f32.mrf.mxu0 }
 0x132   :  { %v162_v47 = vpack.c.bf16 %v157_v46, %v157_v46 }
 0x134   :  { %165 = vst.msk [vmem:[#allocation9] sm:$0xf] %vm164_vm9, %v162_v47 }
 0x139   :  { %v159_v48 = vpop.f32.mrf.mxu0 }
 0x13a   :  { %v163_v49 = vpack.c.bf16 %v159_v48, %v159_v48 }
 0x13c   :  { %166 = vst.msk [vmem:[#allocation9 + $0x4] sm:$0xf] %vm164_vm9, %v163_v49 }
 0x13d   :  { %179 = dma.vmem_to_hbm [thread:$0]  %s172_s2, 128, %s174_s30, [#allocation5], %s324_s22, %s324_s22, %s325_s23  }
 0x13e   :  { %320 = dma.done.wait [#allocation5], 128  }
 0x13f   :  { %321 = vsyncadd [#allocation5], 4294967168 }
 0x140   :  { %184 = vsyncpa [#allocation4], 1 }
 0x141   :  { %185 = vsyncpa [#allocation7], 1 }
 0x142   :  { %186 = vsyncpa [#allocation5], 1 }

</bundles_post_ra>
